<compile_context>
chip_gen: v7x
topology: tpu7x:2x2x1
jax: 0.10.0
libtpu: 0.0.40
codegen_flags: <defaults>
</compile_context>

<pallas_src>
import jax
import jax.numpy as jnp
from jax import lax
from jax.experimental import pallas as pl
from jax.experimental.pallas import tpu as pltpu

LANE = 128
NEG_BIG = -1e30  # baked into padded b3 columns -> exp() underflows to 0 exactly


def _round_up(n, m):
    return ((n + m - 1) // m) * m


def _vmem_limit(need_bytes):
    # Scoped-VMEM defaults are 16 MiB (v5e) / 32 MiB (v6e, v7x); budget from
    # the actual footprint with headroom, capped below v7x's 64 MiB physical.
    return int(min(max(3 * need_bytes, 8 << 20), 48 << 20))


def mlp_kernel(x_ref, w1_ref, b1_ref, w2_ref, b2_ref, w3_ref, b3_ref, out_ref):
    # Activations feeding the MXU are bf16; accumulation / bias / tanh are f32.
    x = x_ref[...].astype(jnp.bfloat16)

    # fc1 + tanh   (padded hidden columns: tanh(0 + 0) == 0, exact)
    h1 = jnp.tanh(
        jnp.dot(x, w1_ref[...], preferred_element_type=jnp.float32) + b1_ref[...]
    )
    # fc2 + tanh
    h2 = jnp.tanh(
        jnp.dot(h1.astype(jnp.bfloat16), w2_ref[...],
                preferred_element_type=jnp.float32) + b2_ref[...]
    )
    # fc3: padded logit columns already carry -1e30 through b3's padding
    # (padded w3 columns are 0), so no in-kernel mask is needed.
    z = jnp.dot(h2.astype(jnp.bfloat16), w3_ref[...],
                preferred_element_type=jnp.float32) + b3_ref[...]

    # Numerically stable log_softmax over the feature axis (dim=1).
    m = jnp.max(z, axis=-1, keepdims=True)
    s = z - m
    lse = jnp.log(jnp.sum(jnp.exp(s), axis=-1, keepdims=True))
    out_ref[...] = (s - lse).astype(out_ref.dtype)


def pad_params(params):
    """Zero-pad so all lane (last) dims are multiples of 128; cast weights to
    bf16; bake the logit mask (-1e30) into the padded columns of b3.

    Done once at parameter-setup time, not per forward call."""
    w1, b1, w2, b2, w3, b3 = params
    h1, h2, out = w1.shape[1], w2.shape[1], w3.shape[1]
    h1p, h2p, outp = _round_up(h1, LANE), _round_up(h2, LANE), _round_up(out, LANE)

    def pad2(a, rows, cols, fill=0.0):
        return jnp.pad(a, ((0, rows - a.shape[0]), (0, cols - a.shape[1])),
                       constant_values=fill)

    # Weights: bf16 operands for the MXU (accumulation stays f32 in-kernel).
    w1p = pad2(w1, w1.shape[0], h1p).astype(jnp.bfloat16)
    w2p = pad2(w2, h1p, h2p).astype(jnp.bfloat16)
    w3p = pad2(w3, h2p, outp).astype(jnp.bfloat16)
    # Biases: f32 (added to the f32 accumulator).
    b1p = pad2(b1, 1, h1p).astype(jnp.float32)
    b2p = pad2(b2, 1, h2p).astype(jnp.float32)
    b3p = pad2(b3, 1, outp, fill=NEG_BIG).astype(jnp.float32)
    return (w1p, b1p, w2p, b2p, w3p, b3p), out


def mynet_forward(x, padded_params, *, row_tile=256, small_batch_max=256):
    """Returns log-probs in a lane-dense padded buffer (batch, out_pad);
    padded columns hold ~-1e30.  Consumers needing exactly `output_size`
    columns slice outside this hot path (or fuse the consumer in the same jit)."""
    w1, b1, w2, b2, w3, b3 = padded_params
    batch, in_f = x.shape
    h1p, h2p, out_pad = w1.shape[1], w2.shape[1], w3.shape[1]
    weight_args = (w1, b1, w2, b2, w3, b3)
    param_bytes = sum(int(p.size) * p.dtype.itemsize for p in weight_args)

    # Advisory cost estimate so XLA can schedule/overlap the custom call.
    cost = pl.CostEstimate(
        flops=2 * batch * (in_f * h1p + h1p * h2p + h2p * out_pad),
        transcendentals=batch * (h1p + h2p + out_pad),  # tanh, tanh, exp
        bytes_accessed=int(x.size * x.dtype.itemsize + param_bytes
                           + batch * out_pad * 4),
    )

    if batch <= small_batch_max:
        # Small batch: single fused block, no grid (no per-step overhead).
        interm = batch * (in_f * 2 + (h1p + h2p + 2 * out_pad) * 4)
        need = (2 * (batch * in_f * x.dtype.itemsize + batch * out_pad * 4)
                + param_bytes + interm)
        full = lambda a: pl.BlockSpec(a.shape, lambda: (0,) * a.ndim)
        return pl.pallas_call(
            mlp_kernel,
            out_shape=jax.ShapeDtypeStruct((batch, out_pad), jnp.float32),
            in_specs=[full(x)] + [full(a) for a in weight_args],
            out_specs=pl.BlockSpec((batch, out_pad), lambda: (0, 0)),
            compiler_params=pltpu.CompilerParams(
                vmem_limit_bytes=_vmem_limit(need)),
            cost_estimate=cost,
        )(x, *weight_args)

    # Large batch: always-gridded row-tiled path (cdiv + zero row padding),
    # weights VMEM-resident across steps.  row_tile=256 keeps per-step VMEM
    # small (v7x: 64 MiB) and gives both v7x TensorCores steady-state work.
    # NOTE: this regime is EUP-bound (tanh/exp), so no further MXU/DMA tuning.
    n_tiles = pl.cdiv(batch, row_tile)
    batch_pad = n_tiles * row_tile
    if batch_pad != batch:
        x = jnp.pad(x, ((0, batch_pad - batch), (0, 0)))

    x_spec = pl.BlockSpec((row_tile, in_f), lambda i: (i, 0))
    o_spec = pl.BlockSpec((row_tile, out_pad), lambda i: (i, 0))
    # Constant-index weights/biases: DMA'd once; single-buffer them so the
    # weight-resident design stays within VMEM as hidden sizes grow.
    w_specs = [pl.BlockSpec(a.shape, lambda i: (0, 0),
                            pipeline_mode=pl.Buffered(1))
               for a in weight_args]

    interm = row_tile * (in_f * 2 + (h1p + h2p + 2 * out_pad) * 4)
    need = (2 * (row_tile * in_f * x.dtype.itemsize + row_tile * out_pad * 4)
            + param_bytes + interm)
    out_padded = pl.pallas_call(
        mlp_kernel,
        out_shape=jax.ShapeDtypeStruct((batch_pad, out_pad), jnp.float32),
        grid=(n_tiles,),
        in_specs=[x_spec] + w_specs,
        out_specs=o_spec,
        compiler_params=pltpu.CompilerParams(
            dimension_semantics=("parallel",),
            vmem_limit_bytes=_vmem_limit(need)),
        cost_estimate=cost,
    )(x, *weight_args)
    return out_padded[:batch] if batch_pad != batch else out_padded


def init_params(key, input_size, hidden1, hidden2, output_size):
    # Deterministic init mimicking nn.Linear's U(-1/sqrt(fan_in), 1/sqrt(fan_in)).
    ks = jax.random.split(key, 6)

    def linear(kw, kb, fan_in, fan_out):
        bound = 1.0 / jnp.sqrt(fan_in)
        w = jax.random.uniform(kw, (fan_in, fan_out), jnp.float32, -bound, bound)
        b = jax.random.uniform(kb, (1, fan_out), jnp.float32, -bound, bound)
        return w, b

    w1, b1 = linear(ks[0], ks[1], input_size, hidden1)
    w2, b2 = linear(ks[2], ks[3], hidden1, hidden2)
    w3, b3 = linear(ks[4], ks[5], hidden2, output_size)
    return (w1, b1, w2, b2, w3, b3)


def reference_forward(x, params):
    # Pure-JAX f32 reference (mirrors the PyTorch module).
    w1, b1, w2, b2, w3, b3 = params
    hp = lax.Precision.HIGHEST
    h1 = jnp.tanh(jnp.dot(x, w1, precision=hp) + b1)
    h2 = jnp.tanh(jnp.dot(h1, w2, precision=hp) + b2)
    z = jnp.dot(h2, w3, precision=hp) + b3
    return jax.nn.log_softmax(z, axis=1)


if __name__ == "__main__":
    # TODO(synk): only the default return_features=False path is implemented.
    input_size, hidden1, hidden2, output_size = 32, 64, 64, 16
    batch = 8

    key = jax.random.PRNGKey(0)
    k_params, k_x = jax.random.split(key)
    params = init_params(k_params, input_size, hidden1, hidden2, output_size)
    x = jax.random.normal(k_x, (batch, input_size), jnp.float32)

    padded_params, out_size = pad_params(params)
    out_padded = mynet_forward(x, padded_params)
    jax.block_until_ready(out_padded)

    assert out_padded.shape == (batch, _round_up(output_size, LANE))
    # Slice back to the true class count only here, outside the hot path.
    out = out_padded[:, :out_size]
    assert out.shape == (batch, output_size)

    # log_softmax rows should exponentiate-sum to ~1 (padded cols are ~-1e30).
    row_sums = jnp.sum(jnp.exp(out), axis=1)
    assert jnp.allclose(row_sums, 1.0, atol=1e-4)

    # Match the pure-JAX f32 reference (bf16 matmul operands => looser tol).
    ref = reference_forward(x, params)
    assert jnp.allclose(out, ref, atol=2e-2, rtol=2e-2), (
        float(jnp.max(jnp.abs(out - ref))))

    print("KERNEL_OK")
</pallas_src>

<mosaic_0001>
module attributes {stable_mosaic.version = 11 : i64} {
  func.func @mlp_kernel(%arg0: memref<8x32xf32, #tpu.memory_space<vmem>>, %arg1: memref<32x128xbf16, #tpu.memory_space<vmem>>, %arg2: memref<1x128xf32, #tpu.memory_space<vmem>>, %arg3: memref<128x128xbf16, #tpu.memory_space<vmem>>, %arg4: memref<1x128xf32, #tpu.memory_space<vmem>>, %arg5: memref<128x128xbf16, #tpu.memory_space<vmem>>, %arg6: memref<1x128xf32, #tpu.memory_space<vmem>>, %arg7: memref<8x128xf32, #tpu.memory_space<vmem>>) attributes {dimension_semantics = [], scalar_prefetch = 0 : i64, scratch_operands = 0 : i64, tpu.core_type = #tpu.core_type<tc>} {
    %c0 = arith.constant 0 : index
    %c0_0 = arith.constant 0 : index
    %0 = vector.load %arg0[%c0, %c0_0] : memref<8x32xf32, #tpu.memory_space<vmem>>, vector<8x32xf32>
    %1 = arith.truncf %0 : vector<8x32xf32> to vector<8x32xbf16>
    %c0_1 = arith.constant 0 : index
    %c0_2 = arith.constant 0 : index
    %2 = vector.load %arg1[%c0_1, %c0_2] : memref<32x128xbf16, #tpu.memory_space<vmem>>, vector<32x128xbf16>
    %cst = arith.constant dense<0.000000e+00> : vector<8x128xf32>
    %3 = tpu.matmul %1, %2, %cst {dimension_numbers = #tpu.dot_dimension_numbers<[1], [0], [0], [1], [0, 0, 1, 1], [], []>} : vector<8x32xbf16>, vector<32x128xbf16>, vector<8x128xf32> -> vector<8x128xf32>
    %c0_3 = arith.constant 0 : index
    %c0_4 = arith.constant 0 : index
    %4 = vector.load %arg2[%c0_3, %c0_4] : memref<1x128xf32, #tpu.memory_space<vmem>>, vector<1x128xf32>
    %5 = vector.broadcast %4 : vector<1x128xf32> to vector<8x128xf32>
    %6 = arith.addf %3, %5 : vector<8x128xf32>
    %7 = math.tanh %6 : vector<8x128xf32>
    %8 = arith.truncf %7 : vector<8x128xf32> to vector<8x128xbf16>
    %c0_5 = arith.constant 0 : index
    %c0_6 = arith.constant 0 : index
    %9 = vector.load %arg3[%c0_5, %c0_6] : memref<128x128xbf16, #tpu.memory_space<vmem>>, vector<128x128xbf16>
    %cst_7 = arith.constant dense<0.000000e+00> : vector<8x128xf32>
    %10 = tpu.matmul %8, %9, %cst_7 {dimension_numbers = #tpu.dot_dimension_numbers<[1], [0], [0], [1], [0, 0, 1, 1], [], []>} : vector<8x128xbf16>, vector<128x128xbf16>, vector<8x128xf32> -> vector<8x128xf32>
    %c0_8 = arith.constant 0 : index
    %c0_9 = arith.constant 0 : index
    %11 = vector.load %arg4[%c0_8, %c0_9] : memref<1x128xf32, #tpu.memory_space<vmem>>, vector<1x128xf32>
    %12 = vector.broadcast %11 : vector<1x128xf32> to vector<8x128xf32>
    %13 = arith.addf %10, %12 : vector<8x128xf32>
    %14 = math.tanh %13 : vector<8x128xf32>
    %15 = arith.truncf %14 : vector<8x128xf32> to vector<8x128xbf16>
    %c0_10 = arith.constant 0 : index
    %c0_11 = arith.constant 0 : index
    %16 = vector.load %arg5[%c0_10, %c0_11] : memref<128x128xbf16, #tpu.memory_space<vmem>>, vector<128x128xbf16>
    %cst_12 = arith.constant dense<0.000000e+00> : vector<8x128xf32>
    %17 = tpu.matmul %15, %16, %cst_12 {dimension_numbers = #tpu.dot_dimension_numbers<[1], [0], [0], [1], [0, 0, 1, 1], [], []>} : vector<8x128xbf16>, vector<128x128xbf16>, vector<8x128xf32> -> vector<8x128xf32>
    %c0_13 = arith.constant 0 : index
    %c0_14 = arith.constant 0 : index
    %18 = vector.load %arg6[%c0_13, %c0_14] : memref<1x128xf32, #tpu.memory_space<vmem>>, vector<1x128xf32>
    %19 = vector.broadcast %18 : vector<1x128xf32> to vector<8x128xf32>
    %20 = arith.addf %17, %19 : vector<8x128xf32>
    %cst_15 = arith.constant dense<0xFF800000> : vector<8xf32>
    %21 = vector.multi_reduction <maximumf>, %20, %cst_15 [1] : vector<8x128xf32> to vector<8xf32>
    %22 = vector.shape_cast %21 : vector<8xf32> to vector<8x1xf32>
    %23 = vector.broadcast %22 : vector<8x1xf32> to vector<8x128xf32>
    %24 = arith.subf %20, %23 : vector<8x128xf32>
    %25 = math.exp %24 : vector<8x128xf32>
    %cst_16 = arith.constant dense<0.000000e+00> : vector<8xf32>
    %26 = vector.multi_reduction <add>, %25, %cst_16 [1] : vector<8x128xf32> to vector<8xf32>
    %27 = vector.shape_cast %26 : vector<8xf32> to vector<8x1xf32>
    %28 = math.log %27 : vector<8x1xf32>
    %29 = vector.broadcast %28 : vector<8x1xf32> to vector<8x128xf32>
    %30 = arith.subf %24, %29 : vector<8x128xf32>
    %c0_17 = arith.constant 0 : index
    %c0_18 = arith.constant 0 : index
    %31 = vector.load %arg7[%c0_17, %c0_18] : memref<8x128xf32, #tpu.memory_space<vmem>>, vector<8x128xf32>
    tpu.vector_store %arg7[%c0_17, %c0_18], %30 {strides = array<i32>} : memref<8x128xf32, #tpu.memory_space<vmem>>, vector<8x128xf32>,
    return
  }
}

</mosaic_0001>

<bundles_post_ra>
// kernel: tpu_custom_call.1
= control target key start
LH: loop header
LB: loop body
LE: loop exit
PB: predicated region body
PF: predicated region fallthrough
CT: control target
= control target key end

     0   :  { %12 = vsyncpa [#allocation3], 0  ;;  %s799_s0 = inlined_call_operand.hbm [shape: f32[8,32], index: 0, kind: input, shape index: {}]   ;;  %s800_s1 = inlined_call_operand.hbm [shape: bf16[32,128], index: 1, kind: input, shape index: {}]   ;;  %s801_s2 = inlined_call_operand.vmem [shape: f32[1,128], index: 2, kind: input, shape index: {}]   ;;  %s802_s3 = inlined_call_operand.hbm [shape: bf16[128,128], index: 3, kind: input, shape index: {}]   ;;  %s803_s4 = inlined_call_operand.vmem [shape: f32[1,128], index: 4, kind: input, shape index: {}]   ;;  %s804_s5 = inlined_call_operand.hbm [shape: bf16[128,128], index: 5, kind: input, shape index: {}]   ;;  %s805_s6 = inlined_call_operand.vmem [shape: f32[1,128], index: 6, kind: input, shape index: {}]   ;;  %s806_s7 = inlined_call_operand.hbm [shape: f32[8,128], index: 7, kind: output, shape index: {}]  }
   0x1   :  { %13 = vsyncpa [#allocation6], 0 }
   0x2   :  { %14 = vsyncpa [#allocation9], 0 }
   0x3   :  { %15 = vsyncpa [#allocation4], 0  ;;  %s648_s24 = smov [#allocation5]   ;;  %s530_s28 = scalar_lea.hbm %s800_s1, 256 }
   0x4   :  { %s31_s25 = sshll.u32 %s648_s24, 4  ;;  %p531_p0 = scmp.ne.s32.totalorder %s800_s1, %s530_s28  ;;  %s32_s25 = int_to_ptr.vmem [resolvable:$true] %s31_s25 }
   0x5   :  { %p534_p1 = scmp.lt.u32.totalorder %s530_s28, %s800_s1 }
   0x7   :  { %p536_p2 = pnand %p534_p1, %p531_p0 }
   0x9   :  { %539 = shalt.err (!%p536_p2)
}
   0xa   :  { %s540_s10 = scalar_lea.vmem %s32_s25, 256  ;;  %p545_p4 = scmp.lt.s32.totalorder %s32_s25, %s32_s25 }
   0xb   :  { %p541_p3 = scmp.ne.s32.totalorder %s32_s25, %s540_s10  ;;  %p546_p5 = scmp.lt.s32.totalorder %s540_s10, %s540_s10 }
   0xd   :  { %p547_p6 = por %p546_p5, %p545_p4 }
   0xf   :  { %p548_p7 = pnand %p547_p6, %p541_p3 }
  0x11   :  { %551 = shalt.err (!%p548_p7)
}
  0x12   :  { %s649_s11 = smov 64   ;;  %s650_s12 = smov 4  }
  0x13   :  { %37 = dma.hbm_to_vmem [thread:$0]  %s800_s1, 256, %s32_s25, [#allocation6], %s649_s11, %s649_s11, %s650_s12  }
  0x14   :  { %s651_s15 = smov [#allocation2]   ;;  %s652_s17 = smov [#allocation7]  }
  0x15   :  { %s22_s16 = sshll.u32 %s651_s15, 4  ;;  %s45_s18 = sshll.u32 %s652_s17, 4  ;;  %s23_s16 = int_to_ptr.vmem [resolvable:$true] %s22_s16  ;;  %s46_s18 = int_to_ptr.vmem [resolvable:$true] %s45_s18 }
  0x16   :  { %s552_s21 = scalar_lea.hbm %s799_s0, 128 }
  0x17   :  { %p553_p8 = scmp.ne.s32.totalorder %s799_s0, %s552_s21  ;;  %p556_p9 = scmp.lt.u32.totalorder %s552_s21, %s799_s0 }
  0x19   :  { %p558_p10 = pnand %p556_p9, %p553_p8 }
  0x1b   :  { %561 = shalt.err (!%p558_p10)
}
  0x1c   :  { %s562_s1 = scalar_lea.vmem %s23_s16, 128  ;;  %p567_p12 = scmp.lt.s32.totalorder %s23_s16, %s23_s16 }
  0x1d   :  { %p563_p11 = scmp.ne.s32.totalorder %s23_s16, %s562_s1  ;;  %p568_p13 = scmp.lt.s32.totalorder %s562_s1, %s562_s1 }
  0x1f   :  { %p569_p0 = por %p568_p13, %p567_p12 }
  0x21   :  { %p570_p1 = pnand %p569_p0, %p563_p11 }
  0x23   :  { %573 = shalt.err (!%p570_p1)
}
  0x24   :  { %25 = dma.hbm_to_vmem [thread:$0]  %s799_s0, 128, %s23_s16, [#allocation3]  }
  0x25   :  { %s574_s30 = scalar_lea.hbm %s802_s3, 1024 }
  0x26   :  { %p575_p2 = scmp.ne.s32.totalorder %s802_s3, %s574_s30  ;;  %p578_p3 = scmp.lt.u32.totalorder %s574_s30, %s802_s3 }
  0x28   :  { %p580_p4 = pnand %p578_p3, %p575_p2 }
  0x2a   :  { %583 = shalt.err (!%p580_p4)
}
  0x2b   :  { %s584_s14 = scalar_lea.vmem %s46_s18, 1024  ;;  %p589_p6 = scmp.lt.s32.totalorder %s46_s18, %s46_s18 }
  0x2c   :  { %p585_p5 = scmp.ne.s32.totalorder %s46_s18, %s584_s14  ;;  %p590_p7 = scmp.lt.s32.totalorder %s584_s14, %s584_s14 }
  0x2e   :  { %p591_p8 = por %p590_p7, %p589_p6 }
  0x30   :  { %p592_p9 = pnand %p591_p8, %p585_p5 }
  0x32   :  { %595 = shalt.err (!%p592_p9)
}
  0x33   :  { %51 = dma.hbm_to_vmem [thread:$0]  %s802_s3, 1024, %s46_s18, [#allocation6], %s649_s11, %s649_s11, %s650_s12  }
  0x34   :  { %s653_s16 = smov [#allocation8]   ;;  %s596_s21 = scalar_lea.hbm %s804_s5, 1024 }
  0x35   :  { %s59_s17 = sshll.u32 %s653_s16, 4  ;;  %p597_p10 = scmp.ne.s32.totalorder %s804_s5, %s596_s21  ;;  %s60_s17 = int_to_ptr.vmem [resolvable:$true] %s59_s17 }
  0x36   :  { %p600_p11 = scmp.lt.u32.totalorder %s596_s21, %s804_s5 }
  0x38   :  { %p602_p12 = pnand %p600_p11, %p597_p10 }
  0x3a   :  { %605 = shalt.err (!%p602_p12)
}
  0x3b   :  { %s606_s1 = scalar_lea.vmem %s60_s17, 1024  ;;  %p611_p0 = scmp.lt.s32.totalorder %s60_s17, %s60_s17 }
  0x3c   :  { %p607_p13 = scmp.ne.s32.totalorder %s60_s17, %s606_s1  ;;  %p612_p1 = scmp.lt.s32.totalorder %s606_s1, %s606_s1 }
  0x3e   :  { %p613_p2 = por %p612_p1, %p611_p0 }
  0x40   :  { %p614_p3 = pnand %p613_p2, %p607_p13 }
  0x42   :  { %617 = shalt.err (!%p614_p3)
}
  0x43   :  { %65 = dma.hbm_to_vmem [thread:$0]  %s804_s5, 1024, %s60_s17, [#allocation9], %s649_s11, %s649_s11, %s650_s12  }
  0x44   :  { %640 = dma.done.wait [#allocation3], 128  }
  0x45   :  { %641 = vsyncadd [#allocation3], 4294967168 }
  0x46   :  { %642 = dma.done.wait [#allocation6], 1280  }
  0x47   :  { %643 = vsyncadd [#allocation6], 4294966016 }
  0x48   :  { %644 = dma.done.wait [#allocation9], 1024  }
  0x49   :  { %645 = vsyncadd [#allocation9], 4294966272  ;;  %v654_v0 = vmov 0.0   ;;  %vm655_vm0 = vmmov 0   ;;  %v504_v1 = vld [vmem:[#allocation5] sm:$0xff]   ;;  %v505_v2 = vld [vmem:[#allocation5 + $0x8] sm:$0xff]  }
  0x4a   :  { %447 = vmatprep.subr.bf16.mxu0 %v654_v0  ;;  %451 = vmatprep.mubr.msk.bf16.mxu0 %vm655_vm0, %v654_v0  ;;  %v81_v3 = vld [vmem:[#allocation2] sm:$0xff]  ;;  %v506_v4 = vld [vmem:[#allocation7] sm:$0xff]   ;;  %vm106_vm1 = vcmask 261120   ;;  %v508_v7 = vld [vmem:[#allocation7 + $0x10] sm:$0xff]  }
  0x4b   :  { %455 = vmatprep.subr.bf16.mxu1 %v654_v0  ;;  %471 = vmatprep.mubr.msk.bf16.mxu1 %vm655_vm0, %v654_v0  ;;  %v82_v5 = vpack.c.bf16 %v81_v3, %v81_v3  ;;  %v507_v6 = vld [vmem:[#allocation7 + $0x8] sm:$0xff]   ;;  %v509_v8 = vld [vmem:[#allocation7 + $0x18] sm:$0xff]   ;;  %v510_v9 = vld [vmem:[#allocation7 + $0x20] sm:$0xff]  }
  0x4c   :  { %448 = vmatpush3.bf16.msra.mxu0 %v504_v1  ;;  %456 = vmatpush3.bf16.msra.mxu1 %v506_v4  ;;  %v511_v10 = vld [vmem:[#allocation7 + $0x28] sm:$0xff]   ;;  %v512_v11 = vld [vmem:[#allocation7 + $0x30] sm:$0xff]   ;;  %v513_v12 = vld [vmem:[#allocation7 + $0x38] sm:$0xff]  }
  0x4d   :  { %449 = vmatprep.subr.bf16.mxu0 %v654_v0  ;;  %457 = vmatprep.subr.bf16.mxu1 %v654_v0  ;;  %v514_v13 = vld [vmem:[#allocation8] sm:$0xff]   ;;  %v515_v14 = vld [vmem:[#allocation8 + $0x8] sm:$0xff]   ;;  %v516_v15 = vld [vmem:[#allocation8 + $0x10] sm:$0xff]  }
  0x4e   :  { %v517_v16 = vld [vmem:[#allocation8 + $0x18] sm:$0xff]   ;;  %v404_v17 = vld [vmem:[%s801_s2] ss:$0 sm:$0xff]  ;;  %v518_v25 = vld [vmem:[#allocation8 + $0x20] sm:$0xff]  }
  0x4f   :  { %v519_v26 = vld [vmem:[#allocation8 + $0x28] sm:$0xff]   ;;  %v520_v27 = vld [vmem:[#allocation8 + $0x30] sm:$0xff]   ;;  %v521_v28 = vld [vmem:[#allocation8 + $0x38] sm:$0xff]  }
  0x50   :  { %450 = vmatpush3.bf16.msra.mxu0 %v505_v2  ;;  %458 = vmatpush3.bf16.msra.mxu1 %v507_v6  ;;  %v408_v29 = vld [vmem:[%s803_s4] ss:$0 sm:$0xff]  ;;  %s656_s4 = smov [#allocation10]  }
  0x51   :  { %475 = vmatprep.subr.bf16.mxu0 %v654_v0  ;;  %459 = vmatprep.subr.bf16.mxu1 %v654_v0  ;;  %v417_v37 = vld [vmem:[%s805_s6] ss:$0 sm:$0xff]  ;;  %s393_s28 = sshll.u32 %s656_s4, 4  ;;  %s394_s28 = int_to_ptr.vmem [resolvable:$true] %s393_s28 }
  0x52   :  { %s618_s6 = scalar_lea.vmem %s394_s28, 128  ;;  %p623_p5 = scmp.lt.s32.totalorder %s394_s28, %s394_s28 }
  0x53   :  { %452 = vmatmul.mubr.msk.bf16.vlgmr.msra.gmra.mrb[0].mxu0 %vm106_vm1, %v82_v5  ;;  %p619_p4 = scmp.ne.s32.totalorder %s394_s28, %s618_s6  ;;  %p624_p6 = scmp.lt.s32.totalorder %s618_s6, %s618_s6 }
  0x54   :  { %491 = vmatprep.mubr.msk.bf16.mxu0 %vm655_vm0, %v654_v0  ;;  %460 = vmatpush3.bf16.msra.mxu1 %v508_v7 }
  0x55   :  { %461 = vmatprep.subr.bf16.mxu1 %v654_v0  ;;  %476 = vmatpush3.bf16.msra.mxu0 %v514_v13  ;;  %p625_p7 = por %p624_p6, %p623_p5 }
  0x56   :  { %477 = vmatprep.subr.bf16.mxu0 %v654_v0 }
  0x57   :  { %p626_p8 = pnand %p625_p7, %p619_p4 }
  0x58   :  { %462 = vmatpush3.bf16.msra.mxu1 %v509_v8 }
  0x59   :  { %463 = vmatprep.subr.bf16.mxu1 %v654_v0  ;;  %478 = vmatpush3.bf16.msra.mxu0 %v515_v14 }
  0x5a   :  { %479 = vmatprep.subr.bf16.mxu0 %v654_v0 }
  0x5c   :  { %464 = vmatpush3.bf16.msra.mxu1 %v510_v9 }
  0x5d   :  { %465 = vmatprep.subr.bf16.mxu1 %v654_v0  ;;  %480 = vmatpush3.bf16.msra.mxu0 %v516_v15 }
  0x5e   :  { %481 = vmatprep.subr.bf16.mxu0 %v654_v0 }
  0x60   :  { %466 = vmatpush3.bf16.msra.mxu1 %v511_v10 }
  0x61   :  { %467 = vmatprep.subr.bf16.mxu1 %v654_v0  ;;  %482 = vmatpush3.bf16.msra.mxu0 %v517_v16 }
  0x62   :  { %483 = vmatprep.subr.bf16.mxu0 %v654_v0 }
  0x64   :  { %468 = vmatpush3.bf16.msra.mxu1 %v512_v11 }
  0x65   :  { %469 = vmatprep.subr.bf16.mxu1 %v654_v0  ;;  %484 = vmatpush3.bf16.msra.mxu0 %v518_v25 }
  0x66   :  { %485 = vmatprep.subr.bf16.mxu0 %v654_v0 }
  0x68   :  { %470 = vmatpush3.bf16.msra.mxu1 %v513_v12 }
  0x69   :  { %486 = vmatpush3.bf16.msra.mxu0 %v519_v26 }
  0x6a   :  { %487 = vmatprep.subr.bf16.mxu0 %v654_v0 }
  0x6d   :  { %488 = vmatpush3.bf16.msra.mxu0 %v520_v27 }
  0x6e   :  { %489 = vmatprep.subr.bf16.mxu0 %v654_v0 }
  0x71   :  { %490 = vmatpush3.bf16.msra.mxu0 %v521_v28 }
 0x126   :  { %v144_v18 = vpop.f32.mrb[0].mxu0 }
 0x127   :  { %v145_v19 = vadd.f32 %v404_v17, %v144_v18  ;;  %v453_v20 = vpop.f32.mrb[1].mxu0 }
 0x128   :  { %v147_v21 = vpop.f32.mrb[2].mxu0 }
 0x129   :  { %522 = vtanh.f32 %v145_v19  ;;  %v454_v22 = vpop.f32.mrb[3].mxu0 }
 0x133   :  { %v523_v23 = vpop.eup %522 }
 0x134   :  { %v151_v24 = vpack.c.bf16 %v523_v23, %v523_v23 }
 0x136   :  { %472 = vmatmul.mubr.bf16.vlgmr.msra.gmra.mrb[0].mxu1 %v151_v24 }
 0x209   :  { %v257_v30 = vpop.f32.mrb[0].mxu1 }
 0x20a   :  { %v258_v31 = vadd.f32 %v408_v29, %v257_v30  ;;  %v473_v32 = vpop.f32.mrb[1].mxu1 }
 0x20b   :  { %v260_v33 = vpop.f32.mrb[2].mxu1 }
 0x20c   :  { %524 = vtanh.f32 %v258_v31  ;;  %v474_v34 = vpop.f32.mrb[3].mxu1 }
 0x216   :  { %v525_v35 = vpop.eup %524 }
 0x217   :  { %v264_v36 = vpack.c.bf16 %v525_v35, %v525_v35 }
 0x219   :  { %492 = vmatmul.mubr.bf16.vlgmr.msra.gmra.mrb[4].mxu0 %v264_v36 }
 0x2ec   :  { %v370_v38 = vpop.f32.mrb[4].mxu0 }
 0x2ed   :  { %v371_v39 = vadd.f32 %v417_v37, %v370_v38  ;;  %v493_v40 = vpop.f32.mrb[5].mxu0 }
 0x2ee   :  { %v373_v41 = vpop.f32.mrb[6].mxu0 }
 0x2ef   :  { %376 = vmax.xlane.f32.xlu0 %v371_v39  ;;  %v494_v42 = vpop.f32.mrb[7].mxu0 }
 0x37c   :  { %v377_v43 = vpop.xlane.xlu0 %376 }
 0x37d   :  { %v378_v44 = vsub.f32 %v371_v39, %v377_v43 }
 0x37f   :  { %v379_v45 = vmul.f32 1.442695, %v378_v44 }
 0x381   :  { %526 = vpow2.f32 %v379_v45 }
 0x38b   :  { %v527_v46 = vpop.eup %526 }
 0x38c   :  { %381 = vadd.xlane.f32.xlu0 %v527_v46 }
 0x419   :  { %v382_v47 = vpop.xlane.xlu0 %381 }
 0x41a   :  { %528 = vlog2.f32 %v382_v47 }
 0x424   :  { %v529_v48 = vpop.eup %528 }
 0x425   :  { %v384_v49 = vmul.f32 0.6931472, %v529_v48 }
 0x427   :  { %v385_v50 = vsub.f32 %v378_v44, %v384_v49 }
 0x429   :  { %386 = vst [vmem:[#allocation10] sm:$0xff] %v385_v50 }
 0x42a   :  { %629 = shalt.err (!%p626_p8)
}
 0x42b   :  { %s630_s8 = scalar_lea.hbm %s806_s7, 128 }
 0x42c   :  { %p631_p9 = scmp.ne.s32.totalorder %s806_s7, %s630_s8  ;;  %p634_p10 = scmp.lt.u32.totalorder %s630_s8, %s806_s7 }
 0x42e   :  { %p636_p11 = pnand %p634_p10, %p631_p9 }
 0x430   :  { %639 = shalt.err (!%p636_p11)
}
 0x431   :  { %396 = dma.vmem_to_hbm [thread:$0]  %s394_s28, 128, %s806_s7, [#allocation4]  }
 0x432   :  { %646 = dma.done.wait [#allocation4], 128  }
 0x433   :  { %647 = vsyncadd [#allocation4], 4294967168 }
 0x434   :  { %400 = vsyncpa [#allocation3], 1 }
 0x435   :  { %401 = vsyncpa [#allocation6], 1 }
 0x436   :  { %402 = vsyncpa [#allocation9], 1 }
 0x437   :  { %403 = vsyncpa [#allocation4], 1 }

</bundles_post_ra>
